<compile_context>
chip_gen: v7x
topology: tpu7x:2x2x1
jax: 0.10.0
libtpu: 0.0.40
codegen_flags: <defaults>
</compile_context>

<pallas_src>
import math

import jax
import jax.numpy as jnp
from jax.experimental import pallas as pl
from jax.experimental.pallas import tpu as pltpu

# ---- module hyper-parameters (match the PyTorch module) ----
NUM_HEADS = 2
DIM_IN = 4         # emb_dim = M = 4
DIM_OUT = 4        # dim_q = dim_v per head

LANE = 128
DH_PAD = LANE          # per-head lane width (vreg-aligned head slices)
KP = DIM_IN + 1        # projection contraction dim incl. the ones-lane (bias fold)


# --------------------------------------------------------------------------- #
# Kernel
# --------------------------------------------------------------------------- #
def mha_kernel(q_ref, k_ref, v_ref, wq_ref, wk_ref, wv_ref, wo_ref, bo_ref, out_ref):
    """One block of TB batch elements per grid step.

    q_ref/k_ref/v_ref : (TB, S, KP)           bf16; lane DIM_IN is exactly 1.0 (bias lane)
    wq/wk/wv          : (KP, H*DH_PAD)        bf16; row DIM_IN carries the bias;
                                              1/sqrt(M) already folded into the Q path
    wo                : (H*DH_PAD, DIM_IN)    bf16
    bo                : (1, DIM_IN)           f32
    out_ref           : (TB, S, DIM_IN)       f32
    """
    TB, S, _ = q_ref.shape
    TBS = TB * S

    q_in = q_ref[...].reshape(TBS, KP)
    k_in = k_ref[...].reshape(TBS, KP)
    v_in = v_ref[...].reshape(TBS, KP)

    # Fused per-token projections across all heads (biases folded via the ones-lane).
    # Cast the (TBS, H*128) intermediates to bf16 once.
    q_all = jnp.dot(q_in, wq_ref[...],
                    preferred_element_type=jnp.float32).astype(jnp.bfloat16)
    k_all = jnp.dot(k_in, wk_ref[...],
                    preferred_element_type=jnp.float32).astype(jnp.bfloat16)
    v_all = jnp.dot(v_in, wv_ref[...],
                    preferred_element_type=jnp.float32).astype(jnp.bfloat16)

    heads = []
    for h in range(NUM_HEADS):                    # static unroll, NUM_HEADS is tiny
        sl = slice(h * DH_PAD, (h + 1) * DH_PAD)  # 128-aligned lane slice
        q_h = q_all[:, sl].reshape(TB, S, DH_PAD)
        k_h = k_all[:, sl].reshape(TB, S, DH_PAD)
        v_h = v_all[:, sl].reshape(TB, S, DH_PAD)

        # Scores (scale folded into Q weights host-side): (TB, S, S) f32.
        s = jnp.einsum("bqd,bkd->bqk", q_h, k_h,
                       preferred_element_type=jnp.float32)

        # Softmax over the key axis (f32 elementwise; denom via EUP reciprocal).
        m = jnp.max(s, axis=-1, keepdims=True)
        p = jnp.exp(s - m)
        denom = jnp.sum(p, axis=-1, keepdims=True)
        w = p * pl.reciprocal(denom, approx=True)

        # Per-head attention output: (TB, S, DH_PAD) f32.
        o_h = jnp.einsum("bqk,bkd->bqd", w.astype(jnp.bfloat16), v_h,
                         preferred_element_type=jnp.float32)
        heads.append(o_h.reshape(TBS, DH_PAD))

    # Single K = H*128 output projection (128-aligned lane concatenate is layout-cheap).
    o_all = jnp.concatenate(heads, axis=-1).astype(jnp.bfloat16)   # (TBS, H*DH_PAD)
    y = jnp.dot(o_all, wo_ref[...], preferred_element_type=jnp.float32) + bo_ref[...]
    out_ref[...] = y.reshape(TB, S, DIM_IN).astype(out_ref.dtype)


# --------------------------------------------------------------------------- #
# Host-side parameter packing (done ONCE at construction, not per call)
# --------------------------------------------------------------------------- #
def pack_params(params):
    scale = 1.0 / math.sqrt(DIM_OUT)   # M ** 0.5 with M = projected feature dim

    def pack_proj(w, b, s=1.0):
        # w: (H, DIM_IN, DIM_OUT) pre-transposed; b: (H, DIM_OUT)
        wp = jnp.zeros((KP, NUM_HEADS * DH_PAD), jnp.float32)
        for h in range(NUM_HEADS):
            col = h * DH_PAD
            wp = wp.at[:DIM_IN, col:col + DIM_OUT].set(w[h] * s)
            wp = wp.at[DIM_IN, col:col + DIM_OUT].set(b[h] * s)   # bias row (ones-lane)
        return wp.astype(jnp.bfloat16)

    wq = pack_proj(params["wq"], params["bq"], scale)   # fold 1/sqrt(M) into Q path
    wk = pack_proj(params["wk"], params["bk"])
    wv = pack_proj(params["wv"], params["bv"])

    wo = jnp.zeros((NUM_HEADS * DH_PAD, DIM_IN), jnp.float32)
    for h in range(NUM_HEADS):
        wo = wo.at[h * DH_PAD:h * DH_PAD + DIM_OUT, :].set(
            params["wo"][h * DIM_OUT:(h + 1) * DIM_OUT, :])
    bo = params["bo"].reshape(1, DIM_IN).astype(jnp.float32)

    return dict(wq=wq, wk=wk, wv=wv, wo=wo.astype(jnp.bfloat16), bo=bo)


def _pick_batch_block(batch, seq, *, vmem_budget_bytes=8 << 20, min_grid_steps=1):
    """Largest divisor of `batch` whose per-step VMEM working set fits the budget.

    min_grid_steps=1 (default) lets a single grid step cover the whole batch, which is
    optimal on single-TensorCore chips (v5e/v6e); pass min_grid_steps=2 on v7x so the
    parallel batch axis can be sharded across its two TensorCores.
    """
    per_elem = (3 * seq * KP * 2 * 2                 # q/k/v bf16 inputs, double-buffered
                + seq * DIM_IN * 4 * 2               # f32 output tile, double-buffered
                + 3 * seq * NUM_HEADS * DH_PAD * 2   # bf16 q/k/v_all intermediates
                + 2 * NUM_HEADS * seq * seq * 4      # f32 scores + probs
                + 2 * seq * NUM_HEADS * DH_PAD * 4)  # f32 per-head outputs + o_all
    max_tb = max(1, vmem_budget_bytes // per_elem)
    best = 1
    for tb in range(1, batch + 1):
        if batch % tb == 0 and tb <= max_tb and batch // tb >= min_grid_steps:
            best = tb
    return best


# --------------------------------------------------------------------------- #
# Forward (jitted); packed params are passed in, packing happens at init
# --------------------------------------------------------------------------- #
@jax.jit
def _mha_forward(query, key, value, packed):
    B, S, _ = query.shape
    TB = _pick_batch_block(B, S)

    # Append the ones-lane (bias fold) and cast to bf16.  This is a tiny fused pad+cast
    # (~10 B/token), not a 128-lane padded slab.
    def prep(x):
        return jnp.pad(x, ((0, 0), (0, 0), (0, 1)),
                       constant_values=1.0).astype(jnp.bfloat16)

    qp, kp, vp = prep(query), prep(key), prep(value)

    act_spec = pl.BlockSpec((TB, S, KP), lambda b: (b, 0, 0))
    out_spec = pl.BlockSpec((TB, S, DIM_IN), lambda b: (b, 0, 0))

    def const(arr):
        return pl.BlockSpec(arr.shape, lambda b, nd=arr.ndim: (0,) * nd)

    out = pl.pallas_call(
        mha_kernel,
        out_shape=jax.ShapeDtypeStruct((B, S, DIM_IN), jnp.float32),
        grid_spec=pltpu.PrefetchScalarGridSpec(
            num_scalar_prefetch=0,
            grid=(B // TB,),
            in_specs=[
                act_spec, act_spec, act_spec,                    # q, k, v
                const(packed["wq"]), const(packed["wk"]), const(packed["wv"]),
                const(packed["wo"]), const(packed["bo"]),
            ],
            out_specs=out_spec,
        ),
        compiler_params=pltpu.CompilerParams(
            dimension_semantics=("parallel",),
            vmem_limit_bytes=32 * 1024 * 1024),
    )(qp, kp, vp,
      packed["wq"], packed["wk"], packed["wv"],
      packed["wo"], packed["bo"])
    return out


class MultiHeadAttentionPallas:
    """Packs parameters once at construction; __call__ runs the Pallas forward."""

    def __init__(self, params):
        self.packed = pack_params(params)

    def __call__(self, query, key, value):
        return _mha_forward(query, key, value, self.packed)


# --------------------------------------------------------------------------- #
# Init + pure-JAX reference (mirrors the PyTorch module semantics)
# --------------------------------------------------------------------------- #
def init_params(rng):
    """Deterministic init mirroring the module's __init__ (Xavier-uniform, zero bias)."""
    c_qkv = math.sqrt(6.0 / (DIM_IN + DIM_OUT))
    c_out = math.sqrt(6.0 / (NUM_HEADS * DIM_OUT + DIM_IN))
    keys = jax.random.split(rng, 4)
    return {
        # stored pre-transposed: (H, D_in, D_out)
        "wq": jax.random.uniform(keys[0], (NUM_HEADS, DIM_IN, DIM_OUT),
                                 jnp.float32, -c_qkv, c_qkv),
        "wk": jax.random.uniform(keys[1], (NUM_HEADS, DIM_IN, DIM_OUT),
                                 jnp.float32, -c_qkv, c_qkv),
        "wv": jax.random.uniform(keys[2], (NUM_HEADS, DIM_IN, DIM_OUT),
                                 jnp.float32, -c_qkv, c_qkv),
        "bq": jnp.zeros((NUM_HEADS, DIM_OUT), jnp.float32),
        "bk": jnp.zeros((NUM_HEADS, DIM_OUT), jnp.float32),
        "bv": jnp.zeros((NUM_HEADS, DIM_OUT), jnp.float32),
        # output linear, pre-transposed: (H*D_out, D_in)
        "wo": jax.random.uniform(keys[3], (NUM_HEADS * DIM_OUT, DIM_IN),
                                 jnp.float32, -c_out, c_out),
        "bo": jnp.zeros((1, DIM_IN), jnp.float32),
    }


def mha_reference(query, key, value, params):
    outs = []
    for h in range(NUM_HEADS):
        Q = query @ params["wq"][h] + params["bq"][h]
        K = key @ params["wk"][h] + params["bk"][h]
        V = value @ params["wv"][h] + params["bv"][h]
        s = jnp.einsum("bqd,bkd->bqk", Q, K) / math.sqrt(DIM_OUT)
        w = jax.nn.softmax(s, axis=-1)
        outs.append(jnp.einsum("bqk,bkd->bqd", w, V))
    concat = jnp.concatenate(outs, axis=-1)
    return concat @ params["wo"] + params["bo"][0]


if __name__ == "__main__":
    B, S = 2, 8
    rng = jax.random.PRNGKey(0)
    k_p, k_q, k_k, k_v = jax.random.split(rng, 4)

    params = init_params(k_p)
    query = jax.random.normal(k_q, (B, S, DIM_IN), jnp.float32)
    key = jax.random.normal(k_k, (B, S, DIM_IN), jnp.float32)
    value = jax.random.normal(k_v, (B, S, DIM_IN), jnp.float32)

    mha = MultiHeadAttentionPallas(params)      # packs parameters once
    out = mha(query, key, value)
    out = jax.block_until_ready(out)

    ref = mha_reference(query, key, value, params)
    assert out.shape == (B, S, DIM_IN)
    # bf16 MXU operands + approx reciprocal -> bf16-level tolerance vs the f32 reference.
    assert jnp.allclose(out, ref, atol=2e-2, rtol=2e-2), "mismatch vs reference"

    print("KERNEL_OK")
</pallas_src>

<mosaic_0001>
module attributes {stable_mosaic.version = 11 : i64} {
  func.func @mha_kernel(%arg0: i32, %arg1: memref<2x8x5xbf16, #tpu.memory_space<vmem>>, %arg2: memref<2x8x5xbf16, #tpu.memory_space<vmem>>, %arg3: memref<2x8x5xbf16, #tpu.memory_space<vmem>>, %arg4: memref<5x256xbf16, #tpu.memory_space<vmem>>, %arg5: memref<5x256xbf16, #tpu.memory_space<vmem>>, %arg6: memref<5x256xbf16, #tpu.memory_space<vmem>>, %arg7: memref<256x4xbf16, #tpu.memory_space<vmem>>, %arg8: memref<1x4xf32, #tpu.memory_space<vmem>>, %arg9: memref<2x8x4xf32, #tpu.memory_space<vmem>>) attributes {dimension_semantics = [#tpu.dimension_semantics<parallel>], iteration_bounds = array<i64: 1>, scalar_prefetch = 0 : i64, scratch_operands = 0 : i64, tpu.core_type = #tpu.core_type<tc>, window_params = [{transform_indices = @transform_0, window_bounds = array<i64: 2, 8, 5>}, {transform_indices = @transform_1, window_bounds = array<i64: 2, 8, 5>}, {transform_indices = @transform_2, window_bounds = array<i64: 2, 8, 5>}, {pipeline_mode = #tpu.pipeline_mode<synchronous>, transform_indices = @transform_3, window_bounds = array<i64: 5, 256>}, {pipeline_mode = #tpu.pipeline_mode<synchronous>, transform_indices = @transform_4, window_bounds = array<i64: 5, 256>}, {pipeline_mode = #tpu.pipeline_mode<synchronous>, transform_indices = @transform_5, window_bounds = array<i64: 5, 256>}, {pipeline_mode = #tpu.pipeline_mode<synchronous>, transform_indices = @transform_6, window_bounds = array<i64: 256, 4>}, {pipeline_mode = #tpu.pipeline_mode<synchronous>, transform_indices = @transform_7, window_bounds = array<i64: 1, 4>}, {transform_indices = @transform_8, window_bounds = array<i64: 2, 8, 4>}]} {
    %c0 = arith.constant 0 : index
    %c0_0 = arith.constant 0 : index
    %c0_1 = arith.constant 0 : index
    %0 = vector.load %arg1[%c0, %c0_0, %c0_1] : memref<2x8x5xbf16, #tpu.memory_space<vmem>>, vector<2x8x5xbf16>
    %1 = vector.shape_cast %0 : vector<2x8x5xbf16> to vector<16x5xbf16>
    %c0_2 = arith.constant 0 : index
    %c0_3 = arith.constant 0 : index
    %c0_4 = arith.constant 0 : index
    %2 = vector.load %arg2[%c0_2, %c0_3, %c0_4] : memref<2x8x5xbf16, #tpu.memory_space<vmem>>, vector<2x8x5xbf16>
    %3 = vector.shape_cast %2 : vector<2x8x5xbf16> to vector<16x5xbf16>
    %c0_5 = arith.constant 0 : index
    %c0_6 = arith.constant 0 : index
    %c0_7 = arith.constant 0 : index
    %4 = vector.load %arg3[%c0_5, %c0_6, %c0_7] : memref<2x8x5xbf16, #tpu.memory_space<vmem>>, vector<2x8x5xbf16>
    %5 = vector.shape_cast %4 : vector<2x8x5xbf16> to vector<16x5xbf16>
    %c0_8 = arith.constant 0 : index
    %c0_9 = arith.constant 0 : index
    %6 = vector.load %arg4[%c0_8, %c0_9] : memref<5x256xbf16, #tpu.memory_space<vmem>>, vector<5x256xbf16>
    %cst = arith.constant dense<0.000000e+00> : vector<16x256xf32>
    %7 = tpu.matmul %1, %6, %cst {dimension_numbers = #tpu.dot_dimension_numbers<[1], [0], [0], [1], [0, 0, 1, 1], [], []>} : vector<16x5xbf16>, vector<5x256xbf16>, vector<16x256xf32> -> vector<16x256xf32>
    %8 = arith.truncf %7 : vector<16x256xf32> to vector<16x256xbf16>
    %c0_10 = arith.constant 0 : index
    %c0_11 = arith.constant 0 : index
    %9 = vector.load %arg5[%c0_10, %c0_11] : memref<5x256xbf16, #tpu.memory_space<vmem>>, vector<5x256xbf16>
    %cst_12 = arith.constant dense<0.000000e+00> : vector<16x256xf32>
    %10 = tpu.matmul %3, %9, %cst_12 {dimension_numbers = #tpu.dot_dimension_numbers<[1], [0], [0], [1], [0, 0, 1, 1], [], []>} : vector<16x5xbf16>, vector<5x256xbf16>, vector<16x256xf32> -> vector<16x256xf32>
    %11 = arith.truncf %10 : vector<16x256xf32> to vector<16x256xbf16>
    %c0_13 = arith.constant 0 : index
    %c0_14 = arith.constant 0 : index
    %12 = vector.load %arg6[%c0_13, %c0_14] : memref<5x256xbf16, #tpu.memory_space<vmem>>, vector<5x256xbf16>
    %cst_15 = arith.constant dense<0.000000e+00> : vector<16x256xf32>
    %13 = tpu.matmul %5, %12, %cst_15 {dimension_numbers = #tpu.dot_dimension_numbers<[1], [0], [0], [1], [0, 0, 1, 1], [], []>} : vector<16x5xbf16>, vector<5x256xbf16>, vector<16x256xf32> -> vector<16x256xf32>
    %14 = arith.truncf %13 : vector<16x256xf32> to vector<16x256xbf16>
    %15 = vector.extract_strided_slice %8 {offsets = [0, 0], sizes = [16, 128], strides = [1, 1]} : vector<16x256xbf16> to vector<16x128xbf16>
    %16 = vector.shape_cast %15 : vector<16x128xbf16> to vector<2x8x128xbf16>
    %17 = vector.extract_strided_slice %11 {offsets = [0, 0], sizes = [16, 128], strides = [1, 1]} : vector<16x256xbf16> to vector<16x128xbf16>
    %18 = vector.shape_cast %17 : vector<16x128xbf16> to vector<2x8x128xbf16>
    %19 = vector.extract_strided_slice %14 {offsets = [0, 0], sizes = [16, 128], strides = [1, 1]} : vector<16x256xbf16> to vector<16x128xbf16>
    %20 = vector.shape_cast %19 : vector<16x128xbf16> to vector<2x8x128xbf16>
    "tpu.trace_start"() <{level = 10 : i32, message = "bqd,bkd->bqk"}> : () -> ()
    %cst_16 = arith.constant dense<0.000000e+00> : vector<2x8x8xf32>
    %21 = tpu.matmul %16, %18, %cst_16 {dimension_numbers = #tpu.dot_dimension_numbers<[2], [2], [1], [1], [0, 0, 0, 1, 1, 1], [0], [0]>} : vector<2x8x128xbf16>, vector<2x8x128xbf16>, vector<2x8x8xf32> -> vector<2x8x8xf32>
    "tpu.trace_stop"() : () -> ()
    %cst_17 = arith.constant dense<0xFF800000> : vector<2x8xf32>
    %22 = vector.multi_reduction <maximumf>, %21, %cst_17 [2] : vector<2x8x8xf32> to vector<2x8xf32>
    %23 = vector.shape_cast %22 : vector<2x8xf32> to vector<2x8x1xf32>
    %24 = vector.broadcast %23 : vector<2x8x1xf32> to vector<2x8x8xf32>
    %25 = arith.subf %21, %24 : vector<2x8x8xf32>
    %26 = math.exp %25 : vector<2x8x8xf32>
    %cst_18 = arith.constant dense<0.000000e+00> : vector<2x8xf32>
    %27 = vector.multi_reduction <add>, %26, %cst_18 [2] : vector<2x8x8xf32> to vector<2x8xf32>
    %28 = vector.shape_cast %27 : vector<2x8xf32> to vector<2x8x1xf32>
    %29 = tpu.reciprocal %28 {approx = true} : vector<2x8x1xf32> -> vector<2x8x1xf32>
    %30 = vector.broadcast %29 : vector<2x8x1xf32> to vector<2x8x8xf32>
    %31 = arith.mulf %26, %30 : vector<2x8x8xf32>
    %32 = arith.truncf %31 : vector<2x8x8xf32> to vector<2x8x8xbf16>
    "tpu.trace_start"() <{level = 10 : i32, message = "bqk,bkd->bqd"}> : () -> ()
    %cst_19 = arith.constant dense<0.000000e+00> : vector<2x8x128xf32>
    %33 = tpu.matmul %32, %20, %cst_19 {dimension_numbers = #tpu.dot_dimension_numbers<[2], [1], [1], [2], [0, 0, 0, 1, 1, 2], [0], [0]>} : vector<2x8x8xbf16>, vector<2x8x128xbf16>, vector<2x8x128xf32> -> vector<2x8x128xf32>
    "tpu.trace_stop"() : () -> ()
    %34 = vector.shape_cast %33 : vector<2x8x128xf32> to vector<16x128xf32>
    %35 = vector.extract_strided_slice %8 {offsets = [0, 128], sizes = [16, 128], strides = [1, 1]} : vector<16x256xbf16> to vector<16x128xbf16>
    %36 = vector.shape_cast %35 : vector<16x128xbf16> to vector<2x8x128xbf16>
    %37 = vector.extract_strided_slice %11 {offsets = [0, 128], sizes = [16, 128], strides = [1, 1]} : vector<16x256xbf16> to vector<16x128xbf16>
    %38 = vector.shape_cast %37 : vector<16x128xbf16> to vector<2x8x128xbf16>
    %39 = vector.extract_strided_slice %14 {offsets = [0, 128], sizes = [16, 128], strides = [1, 1]} : vector<16x256xbf16> to vector<16x128xbf16>
    %40 = vector.shape_cast %39 : vector<16x128xbf16> to vector<2x8x128xbf16>
    "tpu.trace_start"() <{level = 10 : i32, message = "bqd,bkd->bqk"}> : () -> ()
    %cst_20 = arith.constant dense<0.000000e+00> : vector<2x8x8xf32>
    %41 = tpu.matmul %36, %38, %cst_20 {dimension_numbers = #tpu.dot_dimension_numbers<[2], [2], [1], [1], [0, 0, 0, 1, 1, 1], [0], [0]>} : vector<2x8x128xbf16>, vector<2x8x128xbf16>, vector<2x8x8xf32> -> vector<2x8x8xf32>
    "tpu.trace_stop"() : () -> ()
    %cst_21 = arith.constant dense<0xFF800000> : vector<2x8xf32>
    %42 = vector.multi_reduction <maximumf>, %41, %cst_21 [2] : vector<2x8x8xf32> to vector<2x8xf32>
    %43 = vector.shape_cast %42 : vector<2x8xf32> to vector<2x8x1xf32>
    %44 = vector.broadcast %43 : vector<2x8x1xf32> to vector<2x8x8xf32>
    %45 = arith.subf %41, %44 : vector<2x8x8xf32>
    %46 = math.exp %45 : vector<2x8x8xf32>
    %cst_22 = arith.constant dense<0.000000e+00> : vector<2x8xf32>
    %47 = vector.multi_reduction <add>, %46, %cst_22 [2] : vector<2x8x8xf32> to vector<2x8xf32>
    %48 = vector.shape_cast %47 : vector<2x8xf32> to vector<2x8x1xf32>
    %49 = tpu.reciprocal %48 {approx = true} : vector<2x8x1xf32> -> vector<2x8x1xf32>
    %50 = vector.broadcast %49 : vector<2x8x1xf32> to vector<2x8x8xf32>
    %51 = arith.mulf %46, %50 : vector<2x8x8xf32>
    %52 = arith.truncf %51 : vector<2x8x8xf32> to vector<2x8x8xbf16>
    "tpu.trace_start"() <{level = 10 : i32, message = "bqk,bkd->bqd"}> : () -> ()
    %cst_23 = arith.constant dense<0.000000e+00> : vector<2x8x128xf32>
    %53 = tpu.matmul %52, %40, %cst_23 {dimension_numbers = #tpu.dot_dimension_numbers<[2], [1], [1], [2], [0, 0, 0, 1, 1, 2], [0], [0]>} : vector<2x8x8xbf16>, vector<2x8x128xbf16>, vector<2x8x128xf32> -> vector<2x8x128xf32>
    "tpu.trace_stop"() : () -> ()
    %54 = vector.shape_cast %53 : vector<2x8x128xf32> to vector<16x128xf32>
    %55 = tpu.concatenate %34, %54 in 1 : vector<16x128xf32>, vector<16x128xf32> -> vector<16x256xf32>
    %56 = arith.truncf %55 : vector<16x256xf32> to vector<16x256xbf16>
    %c0_24 = arith.constant 0 : index
    %c0_25 = arith.constant 0 : index
    %57 = vector.load %arg7[%c0_24, %c0_25] : memref<256x4xbf16, #tpu.memory_space<vmem>>, vector<256x4xbf16>
    %cst_26 = arith.constant dense<0.000000e+00> : vector<16x4xf32>
    %58 = tpu.matmul %56, %57, %cst_26 {dimension_numbers = #tpu.dot_dimension_numbers<[1], [0], [0], [1], [0, 0, 1, 1], [], []>} : vector<16x256xbf16>, vector<256x4xbf16>, vector<16x4xf32> -> vector<16x4xf32>
    %c0_27 = arith.constant 0 : index
    %c0_28 = arith.constant 0 : index
    %59 = vector.load %arg8[%c0_27, %c0_28] : memref<1x4xf32, #tpu.memory_space<vmem>>, vector<1x4xf32>
    %60 = vector.broadcast %59 : vector<1x4xf32> to vector<16x4xf32>
    %61 = arith.addf %58, %60 : vector<16x4xf32>
    %62 = vector.shape_cast %61 : vector<16x4xf32> to vector<2x8x4xf32>
    %c0_29 = arith.constant 0 : index
    %c0_30 = arith.constant 0 : index
    %c0_31 = arith.constant 0 : index
    %63 = vector.load %arg9[%c0_29, %c0_30, %c0_31] : memref<2x8x4xf32, #tpu.memory_space<vmem>>, vector<2x8x4xf32>
    tpu.vector_store %arg9[%c0_29, %c0_30, %c0_31], %62 {strides = array<i32>} : memref<2x8x4xf32, #tpu.memory_space<vmem>>, vector<2x8x4xf32>,
    return
  }
  func.func @transform_0(%arg0: i32) -> (i32, i32, i32) {
    %c0_i32 = arith.constant 0 : i32
    %c0_i32_0 = arith.constant 0 : i32
    %c0_i32_1 = arith.constant 0 : i32
    return %arg0, %c0_i32, %c0_i32_0 : i32, i32, i32
  }
  func.func @transform_1(%arg0: i32) -> (i32, i32, i32) {
    %c0_i32 = arith.constant 0 : i32
    %c0_i32_0 = arith.constant 0 : i32
    %c0_i32_1 = arith.constant 0 : i32
    return %arg0, %c0_i32, %c0_i32_0 : i32, i32, i32
  }
  func.func @transform_2(%arg0: i32) -> (i32, i32, i32) {
    %c0_i32 = arith.constant 0 : i32
    %c0_i32_0 = arith.constant 0 : i32
    %c0_i32_1 = arith.constant 0 : i32
    return %arg0, %c0_i32, %c0_i32_0 : i32, i32, i32
  }
  func.func @transform_3(%arg0: i32) -> (i32, i32) {
    %c0_i32 = arith.constant 0 : i32
    %c0_i32_0 = arith.constant 0 : i32
    %c0_i32_1 = arith.constant 0 : i32
    return %c0_i32, %c0_i32_0 : i32, i32
  }
  func.func @transform_4(%arg0: i32) -> (i32, i32) {
    %c0_i32 = arith.constant 0 : i32
    %c0_i32_0 = arith.constant 0 : i32
    %c0_i32_1 = arith.constant 0 : i32
    return %c0_i32, %c0_i32_0 : i32, i32
  }
  func.func @transform_5(%arg0: i32) -> (i32, i32) {
    %c0_i32 = arith.constant 0 : i32
    %c0_i32_0 = arith.constant 0 : i32
    %c0_i32_1 = arith.constant 0 : i32
    return %c0_i32, %c0_i32_0 : i32, i32
  }
  func.func @transform_6(%arg0: i32) -> (i32, i32) {
    %c0_i32 = arith.constant 0 : i32
    %c0_i32_0 = arith.constant 0 : i32
    %c0_i32_1 = arith.constant 0 : i32
    return %c0_i32, %c0_i32_0 : i32, i32
  }
  func.func @transform_7(%arg0: i32) -> (i32, i32) {
    %c0_i32 = arith.constant 0 : i32
    %c0_i32_0 = arith.constant 0 : i32
    %c0_i32_1 = arith.constant 0 : i32
    return %c0_i32, %c0_i32_0 : i32, i32
  }
  func.func @transform_8(%arg0: i32) -> (i32, i32, i32) {
    %c0_i32 = arith.constant 0 : i32
    %c0_i32_0 = arith.constant 0 : i32
    %c0_i32_1 = arith.constant 0 : i32
    return %arg0, %c0_i32, %c0_i32_0 : i32, i32, i32
  }
}

</mosaic_0001>

<bundles_post_ra>
// kernel: _mha_forward.1
= control target key start
LH: loop header
LB: loop body
LE: loop exit
PB: predicated region body
PF: predicated region fallthrough
CT: control target
= control target key end

     0   :  { %vm51_vm0 = vcmask 1041408   ;;  %vm52_vm1 = vcmask 1042432   ;;  %v1041_v0 = vmov 65535   ;;  %v1042_v3 = vmov 0   ;;  %s1226_s4 = inlined_call_operand.vmem [shape: bf16[5,256], index: 4, kind: input, shape index: {}]   ;;  %s1227_s1 = inlined_call_operand.vmem [shape: bf16[2,8,5], index: 1, kind: input, shape index: {}]   ;;  %s1228_s3 = inlined_call_operand.vmem [shape: bf16[5,256], index: 3, kind: input, shape index: {}]   ;;  %s1229_s5 = inlined_call_operand.vmem [shape: bf16[5,256], index: 5, kind: input, shape index: {}]   ;;  %s1230_s0 = inlined_call_operand.vmem [shape: bf16[2,8,5], index: 0, kind: input, shape index: {}]   ;;  %s1231_s2 = inlined_call_operand.vmem [shape: bf16[2,8,5], index: 2, kind: input, shape index: {}]   ;;  %s1232_s6 = inlined_call_operand.vmem [shape: bf16[256,4], index: 6, kind: input, shape index: {}]   ;;  %s1233_s7 = inlined_call_operand.vmem [shape: f32[1,4], index: 7, kind: input, shape index: {}]   ;;  %s1234_s8 = inlined_call_operand.vmem [shape: f32[2,8,4], index: 8, kind: output, shape index: {}]  }
   0x1   :  { %v53_v1 = vsel %vm51_vm0, 4294967295, %v1041_v0  ;;  %v106_v2 = vld [vmem:[%s1226_s4] sm:$0x77]  ;;  %158 = vmatprep.mubr.bf16.mxu1 %v1042_v3  ;;  %93 = vmatprep.mubr.bf16.mxu0 %v1042_v3  ;;  %vm47_vm2 = vcmask 39936   ;;  %v1043_v22 = vmov 0.0   ;;  %vm1044_vm3 = vmmov 0  }
   0x2   :  { %v54_v4 = vsel %vm52_vm1, %v53_v1, 0  ;;  %v859_v5 = vcombine.high %v106_v2, %v106_v2  ;;  %v858_v6 = vcombine.low %v106_v2, %v106_v2  ;;  %v36_v7 = vld [vmem:[%s1228_s3] sm:$0x77]  ;;  %vm363_vm4 = vcmask 1043456  }
   0x3   :  { %v855_v8 = vcombine.high %v36_v7, %v36_v7  ;;  %v854_v9 = vcombine.low %v36_v7, %v36_v7  ;;  %v171_v12 = vld [vmem:[%s1229_s5] sm:$0x77]  ;;  %vm335_vm5 = vcmask 64512   ;;  %vm846_vm6 = vcmask 31744  }
   0x4   :  { %v124_v10 = vand.u32 %v859_v5, %v54_v4  ;;  %v121_v11 = vand.u32 %v858_v6, %v54_v4  ;;  %v862_v15 = vcombine.low %v171_v12, %v171_v12  ;;  %v863_v16 = vcombine.high %v171_v12, %v171_v12  ;;  %v1002_v17 = vld [vmem:[%s1227_s1] sm:$0xff]  }
   0x5   :  { %v59_v13 = vand.u32 %v855_v8, %v54_v4  ;;  %v56_v14 = vand.u32 %v854_v9, %v54_v4  ;;  %v1005_v18 = vld [vmem:[%s1230_s0] sm:$0xff]  }
   0x6   :  { %126 = vmatprep.subr.bf16.mxu1 %v124_v10  ;;  %v189_v19 = vand.u32 %v863_v16, %v54_v4  ;;  %v186_v20 = vand.u32 %v862_v15, %v54_v4  ;;  %v1008_v21 = vld [vmem:[%s1231_s2] sm:$0xff]  }
   0x7   :  { %127 = vmatpush1.bf16.msra.mxu1 %v121_v11  ;;  %61 = vmatprep.subr.bf16.mxu0 %v59_v13 }
   0x8   :  { %62 = vmatpush1.bf16.msra.mxu0 %v56_v14  ;;  %960 = vmatprep.subr.bf16.mxu1 %v1043_v22 }
   0x9   :  { %191 = vmatprep.subr.bf16.mxu0 %v189_v19 }
   0xa   :  { %860 = vmatmul.mubr.msk.bf16.vlgmr.msra.gmra.mrb[0].mxu1 %vm47_vm2, %v1002_v17 }
   0xb   :  { %856 = vmatmul.mubr.msk.bf16.vlgmr.msra.gmra.mrb[0].mxu0 %vm47_vm2, %v1005_v18  ;;  %962 = vmatprep.mubr.msk.bf16.mxu1 %vm1044_vm3, %v1043_v22 }
   0xc   :  { %192 = vmatpush1.bf16.msra.mxu0 %v186_v20  ;;  %223 = vmatprep.mubr.bf16.mxu0 %v1042_v3 }
   0xd   :  { %948 = vmatprep.subr.bf16.mxu0 %v1043_v22 }
  0x13   :  { %864 = vmatmul.mubr.msk.bf16.vlgmr.msra.gmra.mrb[4].mxu0 %vm47_vm2, %v1008_v21 }
  0x14   :  { %950 = vmatprep.mubr.msk.bf16.mxu0 %vm1044_vm3, %v1043_v22 }
  0xdd   :  { %v160_v23 = vpop.f32.mrb[0].mxu1 }
  0xde   :  { %v900_v24 = vpack.c.bf16 %v160_v23, %v160_v23  ;;  %v1114_v25 = vpop.f32.mrb[1].mxu1  ;;  %v95_v26 = vpop.f32.mrb[0].mxu0 }
  0xdf   :  { %v164_v27 = vpop.f32.mrb[2].mxu1  ;;  %v1116_v28 = vpop.f32.mrb[1].mxu0  ;;  %v898_v32 = vpack.c.bf16 %v95_v26, %v95_v26  ;;  %v906_v8 = vpack.c.bf16 %v1114_v25, %v1114_v25 }
  0xe0   :  { %v1118_v29 = vpop.f32.mrb[3].mxu1  ;;  %949 = vmatpush3.bf16.xpose.msra.mxu0 %v900_v24  ;;  %v99_v30 = vpop.f32.mrb[2].mxu0  ;;  %v901_v33 = vpack.c.bf16 %v164_v27, %v164_v27  ;;  %v904_v11 = vpack.c.bf16 %v1116_v28, %v1116_v28 }
  0xe1   :  { %v1120_v31 = vpop.f32.mrb[3].mxu0  ;;  %954 = vmatprep.subr.bf16.mxu0 %v1043_v22  ;;  %v899_v34 = vpack.c.bf16 %v99_v30, %v99_v30  ;;  %v907_v13 = vpack.c.bf16 %v1118_v29, %v1118_v29 }
  0xe2   :  { %v905_v14 = vpack.c.bf16 %v1120_v31, %v1120_v31 }
  0xe6   :  { %v225_v35 = vpop.f32.mrb[4].mxu0 }
  0xe7   :  { %951 = vmatmul.mubr.bf16.vlgmr.msra.gmra.mrb[8].mxu0 %v898_v32  ;;  %v902_v36 = vpack.c.bf16 %v225_v35, %v225_v35  ;;  %v227_v37 = vpop.f32.mrb[5].mxu0 }
  0xe8   :  { %955 = vmatpush3.bf16.xpose.msra.mxu0 %v901_v33  ;;  %956 = vmatprep.mubr.msk.bf16.mxu0 %vm1044_vm3, %v1043_v22  ;;  %v908_v38 = vpack.c.bf16 %v227_v37, %v227_v37  ;;  %v229_v39 = vpop.f32.mrb[6].mxu0 }
  0xe9   :  { %966 = vmatprep.subr.bf16.mxu0 %v1043_v22  ;;  %v365_v40 = vsel %vm363_vm4, %v902_v36, 0  ;;  %v903_v41 = vpack.c.bf16 %v229_v39, %v229_v39  ;;  %v231_v42 = vpop.f32.mrb[7].mxu0 }
  0xea   :  { %v580_v43 = vsel %vm363_vm4, %v908_v38, 0  ;;  %v909_v44 = vpack.c.bf16 %v231_v42, %v231_v42  ;;  %961 = vmatpush3.bf16.msra.mxu1 %v365_v40 }
  0xeb   :  { %v411_v45 = vsel %vm363_vm4, %v903_v41, 0  ;;  %972 = vmatprep.subr.bf16.mxu1 %v1043_v22 }
  0xec   :  { %v626_v46 = vsel %vm363_vm4, %v909_v44, 0  ;;  %v1009_v44 = vld [vmem:[%s1232_s6 + $0x40] sm:$0xff]  }
  0xef   :  { %957 = vmatmul.mubr.bf16.vlgmr.msra.gmra.mrb[12].mxu0 %v899_v34 }
  0xf0   :  { %968 = vmatprep.mubr.msk.bf16.mxu0 %vm1044_vm3, %v1043_v22  ;;  %967 = vmatpush3.bf16.msra.mxu0 %v411_v45 }
  0xf1   :  { %978 = vmatprep.subr.bf16.mxu0 %v1043_v22 }
 0x1ba   :  { %v289_v47 = vpop.f32.mrb[8].mxu0 }
 0x1bb   :  { %v952_v48 = vpop.f32.mrb[9].mxu0  ;;  %v336_v49 = vsel %vm335_vm5, %v289_v47, -inf }
 0x1bc   :  { %337 = vmax.xlane.f32.xlu0 %v336_v49  ;;  %v292_v50 = vpop.f32.mrb[10].mxu0  ;;  %v1010_v49 = vld [vmem:[%s1232_s6] sm:$0xff]  }
 0x1bd   :  { %v953_v51 = vpop.f32.mrb[11].mxu0 }
 0x1be   :  { %v1011_v51 = vld [vmem:[%s1232_s6 + $0x48] sm:$0xff]  }
 0x1c2   :  { %v329_v52 = vpop.f32.mrb[12].mxu0 }
 0x1c3   :  { %v958_v53 = vpop.f32.mrb[13].mxu0  ;;  %v339_v54 = vsel %vm335_vm5, %v329_v52, -inf }
 0x1c4   :  { %340 = vmax.xlane.f32.xlu0 %v339_v54  ;;  %v332_v55 = vpop.f32.mrb[14].mxu0  ;;  %v1013_v53 = vld [vmem:[%s1232_s6 + $0x50] sm:$0xff]  }
 0x1c5   :  { %v959_v56 = vpop.f32.mrb[15].mxu0 }
 0x1c6   :  { %v1014_v56 = vld [vmem:[%s1232_s6 + $0x10] sm:$0xff]  }
 0x249   :  { %v338_v57 = vpop.xlane.xlu0 %337 }
 0x24a   :  { %v342_v58 = vsub.f32 %v289_v47, %v338_v57 }
 0x24c   :  { %v344_v59 = vmul.f32 1.442695, %v342_v58  ;;  %v1015_v58 = vld [vmem:[%s1232_s6 + $0x58] sm:$0xff]  }
 0x24e   :  { %1025 = vpow2.f32 %v344_v59  ;;  %v1016_v59 = vld [vmem:[%s1232_s6 + $0x18] sm:$0xff]  }
 0x251   :  { %v341_v60 = vpop.xlane.xlu0 %340 }
 0x252   :  { %v343_v61 = vsub.f32 %v329_v52, %v341_v60  ;;  %v1012_v52 = vld [vmem:[%s1232_s6 + $0x8] sm:$0xff]   ;;  %v1017_v60 = vld [vmem:[%s1232_s6 + $0x60] sm:$0xff]  }
 0x254   :  { %v346_v62 = vmul.f32 1.442695, %v343_v61  ;;  %v1018_v61 = vld [vmem:[%s1232_s6 + $0x20] sm:$0xff]  }
 0x256   :  { %1027 = vpow2.f32 %v346_v62  ;;  %v1019_v62 = vld [vmem:[%s1232_s6 + $0x68] sm:$0xff]  }
 0x258   :  { %v1026_v63 = vpop.eup %1025 }
 0x259   :  { %v348_v0 = vsel %vm335_vm5, %v1026_v63, 0.0 }
 0x25a   :  { %349 = vadd.xlane.f32.xlu1 %v348_v0  ;;  %v1021_v0 = vld [vmem:[%s1232_s6 + $0x70] sm:$0xff]  }
 0x260   :  { %v1028_v1 = vpop.eup %1027 }
 0x261   :  { %v351_v2 = vsel %vm335_vm5, %v1028_v1, 0.0 }
 0x262   :  { %352 = vadd.xlane.f32.xlu1 %v351_v2  ;;  %v1023_v2 = vld [vmem:[%s1232_s6 + $0x78] sm:$0xff]  }
 0x2e7   :  { %v350_v3 = vpop.xlane.xlu1 %349 }
 0x2e8   :  { %1029 = vrcp.f32 %v350_v3  ;;  %v1024_v3 = vld [vmem:[%s1232_s6 + $0x38] sm:$0xff]  }
 0x2ef   :  { %v353_v4 = vpop.xlane.xlu1 %352 }
 0x2f0   :  { %1031 = vrcp.f32 %v353_v4 }
 0x2f2   :  { %v1030_v5 = vpop.eup %1029 }
 0x2f3   :  { %v356_v6 = vmul.f32 %v1030_v5, %v1026_v63  ;;  %v1020_v63 = vld [vmem:[%s1232_s6 + $0x28] sm:$0xff]  }
 0x2f5   :  { %v358_v7 = vpack.c.bf16 %v356_v6, %v356_v6 }
 0x2f7   :  { %963 = vmatmul.mubr.msk.bf16.vlgmr.msra.gmra.mrb[4].mxu1 %vm335_vm5, %v358_v7 }
 0x2f8   :  { %973 = vmatpush3.bf16.xpose.msra.mxu1 %v906_v8  ;;  %974 = vmatprep.mubr.msk.bf16.mxu1 %vm1044_vm3, %v1043_v22 }
 0x2f9   :  { %984 = vmatprep.subr.bf16.mxu1 %v1043_v22 }
 0x2fa   :  { %v1032_v9 = vpop.eup %1031 }
 0x2fb   :  { %v357_v10 = vmul.f32 %v1032_v9, %v1028_v1  ;;  %v1022_v1 = vld [vmem:[%s1232_s6 + $0x30] sm:$0xff]  }
 0x2fd   :  { %v359_v12 = vpack.c.bf16 %v357_v10, %v357_v10 }
 0x2ff   :  { %969 = vmatmul.mubr.msk.bf16.vlgmr.msra.gmra.mrb[16].mxu0 %vm335_vm5, %v359_v12  ;;  %975 = vmatmul.mubr.bf16.vlgmr.msra.gmra.mrb[8].mxu1 %v904_v11 }
 0x300   :  { %979 = vmatpush3.bf16.xpose.msra.mxu0 %v907_v13  ;;  %985 = vmatpush3.bf16.msra.mxu1 %v580_v43 }
 0x301   :  { %980 = vmatprep.mubr.msk.bf16.mxu0 %vm1044_vm3, %v1043_v22  ;;  %990 = vmatprep.subr.bf16.mxu0 %v1043_v22 }
 0x302   :  { %986 = vmatprep.mubr.msk.bf16.mxu1 %vm1044_vm3, %v1043_v22  ;;  %926 = vmatprep.subr.bf16.mxu1 %v1009_v44 }
 0x307   :  { %981 = vmatmul.mubr.bf16.vlgmr.msra.gmra.mrb[20].mxu0 %v905_v14  ;;  %v881_v14 = vld [vmem:[%s1233_s7] ss:$0 sm:$0xff] }
 0x308   :  { %991 = vmatpush3.bf16.msra.mxu0 %v626_v46  ;;  %992 = vmatprep.mubr.msk.bf16.mxu0 %vm1044_vm3, %v1043_v22 }
 0x3ca   :  { %v1154_v15 = vpop.f32.mrb[4].mxu1 }
 0x3cb   :  { %v964_v16 = vpop.f32.mrb[5].mxu1 }
 0x3cc   :  { %v404_v17 = vpop.f32.mrb[6].mxu1 }
 0x3cd   :  { %v965_v18 = vpop.f32.mrb[7].mxu1 }
 0x3d2   :  { %v1156_v19 = vpop.f32.mrb[16].mxu0  ;;  %v506_v20 = vpop.f32.mrb[8].mxu1 }
 0x3d3   :  { %v668_v21 = vpack.c.bf16 %v1156_v19, %v1154_v15  ;;  %v970_v23 = vpop.f32.mrb[17].mxu0  ;;  %v976_v24 = vpop.f32.mrb[9].mxu1  ;;  %v552_v25 = vsel %vm335_vm5, %v506_v20, -inf }
 0x3d4   :  { %v509_v26 = vpop.f32.mrb[10].mxu1  ;;  %553 = vmax.xlane.f32.xlu0 %v552_v25  ;;  %v450_v27 = vpop.f32.mrb[18].mxu0 }
 0x3d5   :  { %v971_v28 = vpop.f32.mrb[19].mxu0  ;;  %v977_v22 = vpop.f32.mrb[11].mxu1 }
 0x3da   :  { %v546_v29 = vpop.f32.mrb[20].mxu0 }
 0x3db   :  { %v982_v30 = vpop.f32.mrb[21].mxu0  ;;  %v555_v31 = vsel %vm335_vm5, %v546_v29, -inf }
 0x3dc   :  { %556 = vmax.xlane.f32.xlu1 %v555_v31  ;;  %v549_v32 = vpop.f32.mrb[22].mxu0 }
 0x3dd   :  { %v983_v33 = vpop.f32.mrb[23].mxu0 }
 0x461   :  { %v554_v34 = vpop.xlane.xlu0 %553 }
 0x462   :  { %v558_v35 = vsub.f32 %v506_v20, %v554_v34 }
 0x464   :  { %v560_v36 = vmul.f32 1.442695, %v558_v35 }
 0x466   :  { %1033 = vpow2.f32 %v560_v36 }
 0x469   :  { %v557_v37 = vpop.xlane.xlu1 %556 }
 0x46a   :  { %v559_v38 = vsub.f32 %v546_v29, %v557_v37 }
 0x46c   :  { %v562_v39 = vmul.f32 1.442695, %v559_v38 }
 0x46e   :  { %1035 = vpow2.f32 %v562_v39 }
 0x470   :  { %v1034_v40 = vpop.eup %1033 }
 0x471   :  { %v564_v41 = vsel %vm335_vm5, %v1034_v40, 0.0 }
 0x472   :  { %565 = vadd.xlane.f32.xlu0 %v564_v41 }
 0x478   :  { %v1036_v42 = vpop.eup %1035 }
 0x479   :  { %v567_v43 = vsel %vm335_vm5, %v1036_v42, 0.0 }
 0x47a   :  { %568 = vadd.xlane.f32.xlu1 %v567_v43 }
 0x4ff   :  { %v566_v45 = vpop.xlane.xlu0 %565 }
 0x500   :  { %1037 = vrcp.f32 %v566_v45 }
 0x507   :  { %v569_v46 = vpop.xlane.xlu1 %568 }
 0x508   :  { %1039 = vrcp.f32 %v569_v46 }
 0x50a   :  { %v1038_v47 = vpop.eup %1037 }
 0x50b   :  { %v572_v48 = vmul.f32 %v1038_v47, %v1034_v40 }
 0x50d   :  { %v574_v50 = vpack.c.bf16 %v572_v48, %v572_v48 }
 0x50f   :  { %987 = vmatmul.mubr.msk.bf16.vlgmr.msra.gmra.mrb[12].mxu1 %vm335_vm5, %v574_v50 }
 0x510   :  { %927 = vmatpush3.bf16.msra.mxu1 %v1010_v49 }
 0x511   :  { %928 = vmatprep.subr.bf16.mxu1 %v1011_v51 }
 0x512   :  { %v1040_v54 = vpop.eup %1039 }
 0x513   :  { %v573_v55 = vmul.f32 %v1040_v54, %v1036_v42 }
 0x514   :  { %929 = vmatpush3.bf16.msra.mxu1 %v1012_v52 }
 0x515   :  { %v575_v57 = vpack.c.bf16 %v573_v55, %v573_v55  ;;  %930 = vmatprep.subr.bf16.mxu1 %v1013_v53 }
 0x517   :  { %993 = vmatmul.mubr.msk.bf16.vlgmr.msra.gmra.mrb[24].mxu0 %vm335_vm5, %v575_v57 }
 0x518   :  { %931 = vmatpush3.bf16.msra.mxu1 %v1014_v56 }
 0x519   :  { %932 = vmatprep.subr.bf16.mxu1 %v1015_v58 }
 0x51c   :  { %933 = vmatpush3.bf16.msra.mxu1 %v1016_v59 }
 0x51d   :  { %934 = vmatprep.subr.bf16.mxu1 %v1017_v60 }
 0x520   :  { %935 = vmatpush3.bf16.msra.mxu1 %v1018_v61 }
 0x521   :  { %936 = vmatprep.subr.bf16.mxu1 %v1019_v62 }
 0x524   :  { %937 = vmatpush3.bf16.msra.mxu1 %v1020_v63 }
 0x525   :  { %938 = vmatprep.subr.bf16.mxu1 %v1021_v0 }
 0x528   :  { %939 = vmatpush3.bf16.msra.mxu1 %v1022_v1 }
 0x529   :  { %940 = vmatprep.subr.bf16.mxu1 %v1023_v2 }
 0x52c   :  { %941 = vmatpush3.bf16.msra.mxu1 %v1024_v3 }
 0x5e2   :  { %v616_v4 = vpop.f32.mrb[12].mxu1 }
 0x5e3   :  { %v988_v5 = vpop.f32.mrb[13].mxu1 }
 0x5e4   :  { %v619_v6 = vpop.f32.mrb[14].mxu1 }
 0x5e5   :  { %v989_v7 = vpop.f32.mrb[15].mxu1 }
 0x5ea   :  { %v662_v8 = vpop.f32.mrb[24].mxu0 }
 0x5eb   :  { %v669_v9 = vpack.c.bf16 %v662_v8, %v616_v4  ;;  %v994_v10 = vpop.f32.mrb[25].mxu0 }
 0x5ec   :  { %v665_v11 = vpop.f32.mrb[26].mxu0 }
 0x5ed   :  { %v995_v12 = vpop.f32.mrb[27].mxu0  ;;  %837 = vmatprep.mubr.bf16.mxu1 %v669_v9 }
 0x5ee   :  { %838 = vmatmul.mubr.bf16.vlgmr.msra.gmra.mrb[16].mxu1 %v668_v21 }
 0x6c1   :  { %v942_v13 = vpop.f32.mrb[16].mxu1 }
 0x6c2   :  { %v943_v16 = vpop.f32.mrb[17].mxu1 }
 0x6c3   :  { %v944_v17 = vadd.f32 %v943_v16, %v942_v13  ;;  %v945_v18 = vpop.f32.mrb[18].mxu1 }
 0x6c4   :  { %v946_v20 = vpop.f32.mrb[19].mxu1 }
 0x6c5   :  { %v840_v23 = vadd.f32 %v944_v17, %v881_v14  ;;  %v947_v24 = vadd.f32 %v946_v20, %v945_v18 }
 0x6c7   :  { %847 = vst.msk [vmem:[%s1234_s8] sm:$0xff] %vm846_vm6, %v840_v23  ;;  %v843_v25 = vadd.f32 %v947_v24, %v881_v14 }
 0x6c9   :  { %848 = vst.msk [vmem:[%s1234_s8 + $0x8] sm:$0xff] %vm846_vm6, %v843_v25 }

</bundles_post_ra>
